<compile_context>
chip_gen: v6e
topology: v6e:2x2x1
jax: 0.10.0
libtpu: 0.0.40
codegen_flags: <defaults>
</compile_context>

<pallas_src>
import math
import jax
import jax.numpy as jnp
from jax.experimental import pallas as pl
from jax.experimental.pallas import tpu as pltpu


def _tap_order():
    return [(kh, kw) for kh in range(3) for kw in range(3)]


def _make_tap_masks(H, W, dtype=jnp.float32):
    """(9, H*W) zero-padding validity mask per 3x3 tap (tap order kh*3+kw)."""
    HW = H * W
    pos = jnp.arange(HW, dtype=jnp.int32)
    hh = pos // W
    ww = pos % W
    masks = []
    for kh, kw in _tap_order():
        dh, dw = kh - 1, kw - 1
        valid = ((hh + dh >= 0) & (hh + dh < H) &
                 (ww + dw >= 0) & (ww + dw < W))
        masks.append(valid.astype(dtype))
    return jnp.stack(masks, axis=0)


def _fold_weights(w_hwio):
    """HWIO (3,3,Cin,Cout) -> (Cout, 9*Cin): one MXU contraction per conv."""
    kh, kw, cin, cout = w_hwio.shape
    assert (kh, kw) == (3, 3)
    return jnp.transpose(w_hwio, (3, 0, 1, 2)).reshape(cout, 9 * cin)


def make_fused_attention_kernel(H, W, C):
    """Fused CNN_Attention: two x (conv3x3 + InstanceNorm + LeakyReLU(0.2) + X_input)."""
    HW = H * W
    # Static flat-roll amount per tap: out[p] needs in[p + dh*W + dw].
    shifts = [(-((kh - 1) * W + (kw - 1))) % HW for kh, kw in _tap_order()]

    def kernel(x_ref, w1_ref, w2_ref, mask_ref, o_ref, stack_ref):
        # x_ref   : (1, C, HW)   input, H*W on the lane axis
        # w*_ref  : (C, 9*C)     pre-folded conv weights (one matmul each)
        # mask_ref: (9, HW)      precomputed zero-pad masks, constant block
        # stack_ref: (9*C, HW)   VMEM scratch holding the stacked taps
        x = x_ref[0].astype(jnp.float32)                    # (C, HW)
        mask = mask_ref[...]                                # (9, HW)

        def conv3x3(v, w_ref_):
            # Stack the 9 rolled+masked operands, then a single K=9*C dot.
            for t, shift in enumerate(shifts):
                if shift == 0:
                    xs = v                                  # center tap: never padded
                else:
                    xs = pltpu.roll(v, shift=shift, axis=1) * mask[t:t + 1, :]
                stack_ref[pl.ds(t * C, C), :] = xs
            return jnp.dot(w_ref_[...], stack_ref[...],
                           preferred_element_type=jnp.float32)

        def inorm_lrelu(y):
            # InstanceNorm2d(affine=False, eps=1e-5).  The conv bias is a
            # per-channel constant over H*W, so it cancels here exactly and
            # is never added (only valid for affine=False!).
            inv_n = 1.0 / HW
            mean = jnp.sum(y, axis=-1, keepdims=True) * inv_n
            yc = y - mean
            var = jnp.sum(yc * yc, axis=-1, keepdims=True) * inv_n
            yn = yc * jax.lax.rsqrt(var + 1e-5)
            return jnp.where(yn >= 0.0, yn, 0.2 * yn)       # LeakyReLU(0.2)

        y1 = x + inorm_lrelu(conv3x3(x, w1_ref))            # block 1 (+X_input)
        y2 = x + inorm_lrelu(conv3x3(y1, w2_ref))           # block 2 (+X_input)
        o_ref[0] = y2.astype(o_ref.dtype)

    return kernel


def cnn_attention(x_nchw, w1, b1, w2, b2):
    """Forward pass of CNN_Attention.  x_nchw: (B, C, H, W); w*: HWIO.

    b1/b2 are accepted for nn.Conv2d API parity but are unused: a per-channel
    bias is cancelled exactly by InstanceNorm(affine=False).
    """
    del b1, b2
    B, C, H, W = x_nchw.shape
    HW = H * W
    x = x_nchw.reshape(B, C, HW)                            # free, lane-dense
    w1f = _fold_weights(w1).astype(jnp.float32)             # (C, 9C)
    w2f = _fold_weights(w2).astype(jnp.float32)
    masks = _make_tap_masks(H, W)                           # (9, HW)

    out = pl.pallas_call(
        make_fused_attention_kernel(H, W, C),
        out_shape=jax.ShapeDtypeStruct((B, C, HW), x_nchw.dtype),
        grid_spec=pltpu.PrefetchScalarGridSpec(
            num_scalar_prefetch=0,
            grid=(B,),
            in_specs=[
                pl.BlockSpec((1, C, HW), lambda i: (i, 0, 0)),
                pl.BlockSpec((C, 9 * C), lambda i: (0, 0)),
                pl.BlockSpec((C, 9 * C), lambda i: (0, 0)),
                pl.BlockSpec((9, HW), lambda i: (0, 0)),
            ],
            out_specs=pl.BlockSpec((1, C, HW), lambda i: (i, 0, 0)),
            scratch_shapes=[pltpu.VMEM((9 * C, HW), jnp.float32)],
        ),
        compiler_params=pltpu.CompilerParams(
            dimension_semantics=("parallel",)),
    )(x, w1f, w2f, masks)
    return out.reshape(B, C, H, W)


# --------------------------- pure-JAX reference ---------------------------
def _ref_forward(x_nchw, w1, b1, w2, b2):
    x = jnp.transpose(x_nchw, (0, 2, 3, 1))                 # NCHW -> NHWC

    def conv(v, w, b):
        y = jax.lax.conv_general_dilated(
            v, w, (1, 1), "SAME",
            dimension_numbers=("NHWC", "HWIO", "NHWC"))
        return y + b.reshape(1, 1, 1, -1)

    def in_lrelu(y):
        mean = y.mean(axis=(1, 2), keepdims=True)
        var = ((y - mean) ** 2).mean(axis=(1, 2), keepdims=True)
        yn = (y - mean) / jnp.sqrt(var + 1e-5)
        return jnp.where(yn >= 0, yn, 0.2 * yn)

    y = in_lrelu(conv(x, w1, b1)) + x
    y = in_lrelu(conv(y, w2, b2)) + x
    return jnp.transpose(y, (0, 3, 1, 2))                   # NHWC -> NCHW


if __name__ == "__main__":
    B, C, H, W = 2, 4, 16, 16

    key = jax.random.PRNGKey(0)
    kx, kw1, kb1, kw2, kb2 = jax.random.split(key, 5)

    # Deterministic Conv2d-style init (uniform in +/- 1/sqrt(fan_in)).
    fan_in = C * 3 * 3
    bound = 1.0 / math.sqrt(fan_in)
    w1 = jax.random.uniform(kw1, (3, 3, C, C), jnp.float32, -bound, bound)  # HWIO
    b1 = jax.random.uniform(kb1, (C,), jnp.float32, -bound, bound)
    w2 = jax.random.uniform(kw2, (3, 3, C, C), jnp.float32, -bound, bound)
    b2 = jax.random.uniform(kb2, (C,), jnp.float32, -bound, bound)

    x = jax.random.normal(kx, (B, C, H, W), jnp.float32)    # PyTorch-style NCHW

    out = jax.block_until_ready(cnn_attention(x, w1, b1, w2, b2))
    ref = jax.block_until_ready(_ref_forward(x, w1, b1, w2, b2))

    assert out.shape == (B, C, H, W)
    assert jnp.allclose(out, ref, atol=1e-4, rtol=1e-4), "mismatch vs reference"

    print("KERNEL_OK")
</pallas_src>

<mosaic_0001>
module attributes {stable_mosaic.version = 11 : i64} {
  func.func @kernel(%arg0: i32, %arg1: memref<1x4x256xf32, #tpu.memory_space<vmem>>, %arg2: memref<4x36xf32, #tpu.memory_space<vmem>>, %arg3: memref<4x36xf32, #tpu.memory_space<vmem>>, %arg4: memref<9x256xf32, #tpu.memory_space<vmem>>, %arg5: memref<1x4x256xf32, #tpu.memory_space<vmem>>, %arg6: memref<36x256xf32, #tpu.memory_space<vmem>>) attributes {dimension_semantics = [#tpu.dimension_semantics<parallel>], iteration_bounds = array<i64: 2>, scalar_prefetch = 0 : i64, scratch_operands = 1 : i64, tpu.core_type = #tpu.core_type<tc>, window_params = [{transform_indices = @transform_0, window_bounds = array<i64: 1, 4, 256>}, {pipeline_mode = #tpu.pipeline_mode<synchronous>, transform_indices = @transform_1, window_bounds = array<i64: 4, 36>}, {pipeline_mode = #tpu.pipeline_mode<synchronous>, transform_indices = @transform_2, window_bounds = array<i64: 4, 36>}, {pipeline_mode = #tpu.pipeline_mode<synchronous>, transform_indices = @transform_3, window_bounds = array<i64: 9, 256>}, {transform_indices = @transform_4, window_bounds = array<i64: 1, 4, 256>}]} {
    %c0 = arith.constant 0 : index
    %c0_0 = arith.constant 0 : index
    %c0_1 = arith.constant 0 : index
    %0 = vector.load %arg1[%c0, %c0_0, %c0_1] : memref<1x4x256xf32, #tpu.memory_space<vmem>>, vector<1x4x256xf32>
    %1 = vector.shape_cast %0 : vector<1x4x256xf32> to vector<4x256xf32>
    %c0_2 = arith.constant 0 : index
    %c0_3 = arith.constant 0 : index
    %2 = vector.load %arg4[%c0_2, %c0_3] : memref<9x256xf32, #tpu.memory_space<vmem>>, vector<9x256xf32>
    %c17_i32 = arith.constant 17 : i32
    %3 = tpu.dynamic_rotate %1 by %c17_i32 dim 1 : vector<4x256xf32>, i32 -> vector<4x256xf32>
    %4 = vector.extract_strided_slice %2 {offsets = [0, 0], sizes = [1, 256], strides = [1, 1]} : vector<9x256xf32> to vector<1x256xf32>
    %5 = vector.broadcast %4 : vector<1x256xf32> to vector<4x256xf32>
    %6 = arith.mulf %3, %5 : vector<4x256xf32>
    %c0_4 = arith.constant 0 : index
    %c0_5 = arith.constant 0 : index
    %7 = vector.load %arg6[%c0_4, %c0_5] : memref<36x256xf32, #tpu.memory_space<vmem>>, vector<4x256xf32>
    tpu.vector_store %arg6[%c0_4, %c0_5], %6 {strides = array<i32>} : memref<36x256xf32, #tpu.memory_space<vmem>>, vector<4x256xf32>,
    %c16_i32 = arith.constant 16 : i32
    %8 = tpu.dynamic_rotate %1 by %c16_i32 dim 1 : vector<4x256xf32>, i32 -> vector<4x256xf32>
    %9 = vector.extract_strided_slice %2 {offsets = [1, 0], sizes = [1, 256], strides = [1, 1]} : vector<9x256xf32> to vector<1x256xf32>
    %10 = vector.broadcast %9 : vector<1x256xf32> to vector<4x256xf32>
    %11 = arith.mulf %8, %10 : vector<4x256xf32>
    %c4 = arith.constant 4 : index
    %c0_6 = arith.constant 0 : index
    %12 = vector.load %arg6[%c4, %c0_6] : memref<36x256xf32, #tpu.memory_space<vmem>>, vector<4x256xf32>
    tpu.vector_store %arg6[%c4, %c0_6], %11 {strides = array<i32>} : memref<36x256xf32, #tpu.memory_space<vmem>>, vector<4x256xf32>,
    %c15_i32 = arith.constant 15 : i32
    %13 = tpu.dynamic_rotate %1 by %c15_i32 dim 1 : vector<4x256xf32>, i32 -> vector<4x256xf32>
    %14 = vector.extract_strided_slice %2 {offsets = [2, 0], sizes = [1, 256], strides = [1, 1]} : vector<9x256xf32> to vector<1x256xf32>
    %15 = vector.broadcast %14 : vector<1x256xf32> to vector<4x256xf32>
    %16 = arith.mulf %13, %15 : vector<4x256xf32>
    %c8 = arith.constant 8 : index
    %c0_7 = arith.constant 0 : index
    %17 = vector.load %arg6[%c8, %c0_7] : memref<36x256xf32, #tpu.memory_space<vmem>>, vector<4x256xf32>
    tpu.vector_store %arg6[%c8, %c0_7], %16 {strides = array<i32>} : memref<36x256xf32, #tpu.memory_space<vmem>>, vector<4x256xf32>,
    %c1_i32 = arith.constant 1 : i32
    %18 = tpu.dynamic_rotate %1 by %c1_i32 dim 1 : vector<4x256xf32>, i32 -> vector<4x256xf32>
    %19 = vector.extract_strided_slice %2 {offsets = [3, 0], sizes = [1, 256], strides = [1, 1]} : vector<9x256xf32> to vector<1x256xf32>
    %20 = vector.broadcast %19 : vector<1x256xf32> to vector<4x256xf32>
    %21 = arith.mulf %18, %20 : vector<4x256xf32>
    %c12 = arith.constant 12 : index
    %c0_8 = arith.constant 0 : index
    %22 = vector.load %arg6[%c12, %c0_8] : memref<36x256xf32, #tpu.memory_space<vmem>>, vector<4x256xf32>
    tpu.vector_store %arg6[%c12, %c0_8], %21 {strides = array<i32>} : memref<36x256xf32, #tpu.memory_space<vmem>>, vector<4x256xf32>,
    %c16 = arith.constant 16 : index
    %c0_9 = arith.constant 0 : index
    %23 = vector.load %arg6[%c16, %c0_9] : memref<36x256xf32, #tpu.memory_space<vmem>>, vector<4x256xf32>
    tpu.vector_store %arg6[%c16, %c0_9], %1 {strides = array<i32>} : memref<36x256xf32, #tpu.memory_space<vmem>>, vector<4x256xf32>,
    %c255_i32 = arith.constant 255 : i32
    %24 = tpu.dynamic_rotate %1 by %c255_i32 dim 1 : vector<4x256xf32>, i32 -> vector<4x256xf32>
    %25 = vector.extract_strided_slice %2 {offsets = [5, 0], sizes = [1, 256], strides = [1, 1]} : vector<9x256xf32> to vector<1x256xf32>
    %26 = vector.broadcast %25 : vector<1x256xf32> to vector<4x256xf32>
    %27 = arith.mulf %24, %26 : vector<4x256xf32>
    %c20 = arith.constant 20 : index
    %c0_10 = arith.constant 0 : index
    %28 = vector.load %arg6[%c20, %c0_10] : memref<36x256xf32, #tpu.memory_space<vmem>>, vector<4x256xf32>
    tpu.vector_store %arg6[%c20, %c0_10], %27 {strides = array<i32>} : memref<36x256xf32, #tpu.memory_space<vmem>>, vector<4x256xf32>,
    %c241_i32 = arith.constant 241 : i32
    %29 = tpu.dynamic_rotate %1 by %c241_i32 dim 1 : vector<4x256xf32>, i32 -> vector<4x256xf32>
    %30 = vector.extract_strided_slice %2 {offsets = [6, 0], sizes = [1, 256], strides = [1, 1]} : vector<9x256xf32> to vector<1x256xf32>
    %31 = vector.broadcast %30 : vector<1x256xf32> to vector<4x256xf32>
    %32 = arith.mulf %29, %31 : vector<4x256xf32>
    %c24 = arith.constant 24 : index
    %c0_11 = arith.constant 0 : index
    %33 = vector.load %arg6[%c24, %c0_11] : memref<36x256xf32, #tpu.memory_space<vmem>>, vector<4x256xf32>
    tpu.vector_store %arg6[%c24, %c0_11], %32 {strides = array<i32>} : memref<36x256xf32, #tpu.memory_space<vmem>>, vector<4x256xf32>,
    %c240_i32 = arith.constant 240 : i32
    %34 = tpu.dynamic_rotate %1 by %c240_i32 dim 1 : vector<4x256xf32>, i32 -> vector<4x256xf32>
    %35 = vector.extract_strided_slice %2 {offsets = [7, 0], sizes = [1, 256], strides = [1, 1]} : vector<9x256xf32> to vector<1x256xf32>
    %36 = vector.broadcast %35 : vector<1x256xf32> to vector<4x256xf32>
    %37 = arith.mulf %34, %36 : vector<4x256xf32>
    %c28 = arith.constant 28 : index
    %c0_12 = arith.constant 0 : index
    %38 = vector.load %arg6[%c28, %c0_12] : memref<36x256xf32, #tpu.memory_space<vmem>>, vector<4x256xf32>
    tpu.vector_store %arg6[%c28, %c0_12], %37 {strides = array<i32>} : memref<36x256xf32, #tpu.memory_space<vmem>>, vector<4x256xf32>,
    %c239_i32 = arith.constant 239 : i32
    %39 = tpu.dynamic_rotate %1 by %c239_i32 dim 1 : vector<4x256xf32>, i32 -> vector<4x256xf32>
    %40 = vector.extract_strided_slice %2 {offsets = [8, 0], sizes = [1, 256], strides = [1, 1]} : vector<9x256xf32> to vector<1x256xf32>
    %41 = vector.broadcast %40 : vector<1x256xf32> to vector<4x256xf32>
    %42 = arith.mulf %39, %41 : vector<4x256xf32>
    %c32 = arith.constant 32 : index
    %c0_13 = arith.constant 0 : index
    %43 = vector.load %arg6[%c32, %c0_13] : memref<36x256xf32, #tpu.memory_space<vmem>>, vector<4x256xf32>
    tpu.vector_store %arg6[%c32, %c0_13], %42 {strides = array<i32>} : memref<36x256xf32, #tpu.memory_space<vmem>>, vector<4x256xf32>,
    %c0_14 = arith.constant 0 : index
    %c0_15 = arith.constant 0 : index
    %44 = vector.load %arg2[%c0_14, %c0_15] : memref<4x36xf32, #tpu.memory_space<vmem>>, vector<4x36xf32>
    %c0_16 = arith.constant 0 : index
    %c0_17 = arith.constant 0 : index
    %45 = vector.load %arg6[%c0_16, %c0_17] : memref<36x256xf32, #tpu.memory_space<vmem>>, vector<36x256xf32>
    %cst = arith.constant dense<0.000000e+00> : vector<4x256xf32>
    %46 = tpu.matmul %44, %45, %cst {dimension_numbers = #tpu.dot_dimension_numbers<[1], [0], [0], [1], [0, 0, 1, 1], [], []>} : vector<4x36xf32>, vector<36x256xf32>, vector<4x256xf32> -> vector<4x256xf32>
    %cst_18 = arith.constant dense<0.000000e+00> : vector<4xf32>
    %47 = vector.multi_reduction <add>, %46, %cst_18 [1] : vector<4x256xf32> to vector<4xf32>
    %48 = vector.shape_cast %47 : vector<4xf32> to vector<4x1xf32>
    %cst_19 = arith.constant 3.906250e-03 : f32
    %49 = vector.broadcast %cst_19 : f32 to vector<4x1xf32>
    %50 = arith.mulf %48, %49 : vector<4x1xf32>
    %51 = vector.broadcast %50 : vector<4x1xf32> to vector<4x256xf32>
    %52 = arith.subf %46, %51 : vector<4x256xf32>
    %53 = arith.mulf %52, %52 : vector<4x256xf32>
    %cst_20 = arith.constant dense<0.000000e+00> : vector<4xf32>
    %54 = vector.multi_reduction <add>, %53, %cst_20 [1] : vector<4x256xf32> to vector<4xf32>
    %55 = vector.shape_cast %54 : vector<4xf32> to vector<4x1xf32>
    %cst_21 = arith.constant 3.906250e-03 : f32
    %56 = vector.broadcast %cst_21 : f32 to vector<4x1xf32>
    %57 = arith.mulf %55, %56 : vector<4x1xf32>
    %cst_22 = arith.constant 9.99999974E-6 : f32
    %58 = vector.broadcast %cst_22 : f32 to vector<4x1xf32>
    %59 = arith.addf %57, %58 : vector<4x1xf32>
    %60 = math.rsqrt %59 : vector<4x1xf32>
    %61 = vector.broadcast %60 : vector<4x1xf32> to vector<4x256xf32>
    %62 = arith.mulf %52, %61 : vector<4x256xf32>
    %cst_23 = arith.constant 0.000000e+00 : f32
    %63 = vector.broadcast %cst_23 : f32 to vector<4x256xf32>
    %64 = arith.cmpf oge, %62, %63 : vector<4x256xf32>
    %cst_24 = arith.constant 2.000000e-01 : f32
    %65 = vector.broadcast %cst_24 : f32 to vector<4x256xf32>
    %66 = arith.mulf %65, %62 : vector<4x256xf32>
    %67 = arith.select %64, %62, %66 : vector<4x256xi1>, vector<4x256xf32>
    %68 = arith.addf %1, %67 : vector<4x256xf32>
    %c17_i32_25 = arith.constant 17 : i32
    %69 = tpu.dynamic_rotate %68 by %c17_i32_25 dim 1 : vector<4x256xf32>, i32 -> vector<4x256xf32>
    %70 = vector.extract_strided_slice %2 {offsets = [0, 0], sizes = [1, 256], strides = [1, 1]} : vector<9x256xf32> to vector<1x256xf32>
    %71 = vector.broadcast %70 : vector<1x256xf32> to vector<4x256xf32>
    %72 = arith.mulf %69, %71 : vector<4x256xf32>
    %c0_26 = arith.constant 0 : index
    %c0_27 = arith.constant 0 : index
    %73 = vector.load %arg6[%c0_26, %c0_27] : memref<36x256xf32, #tpu.memory_space<vmem>>, vector<4x256xf32>
    tpu.vector_store %arg6[%c0_26, %c0_27], %72 {strides = array<i32>} : memref<36x256xf32, #tpu.memory_space<vmem>>, vector<4x256xf32>,
    %c16_i32_28 = arith.constant 16 : i32
    %74 = tpu.dynamic_rotate %68 by %c16_i32_28 dim 1 : vector<4x256xf32>, i32 -> vector<4x256xf32>
    %75 = vector.extract_strided_slice %2 {offsets = [1, 0], sizes = [1, 256], strides = [1, 1]} : vector<9x256xf32> to vector<1x256xf32>
    %76 = vector.broadcast %75 : vector<1x256xf32> to vector<4x256xf32>
    %77 = arith.mulf %74, %76 : vector<4x256xf32>
    %c4_29 = arith.constant 4 : index
    %c0_30 = arith.constant 0 : index
    %78 = vector.load %arg6[%c4_29, %c0_30] : memref<36x256xf32, #tpu.memory_space<vmem>>, vector<4x256xf32>
    tpu.vector_store %arg6[%c4_29, %c0_30], %77 {strides = array<i32>} : memref<36x256xf32, #tpu.memory_space<vmem>>, vector<4x256xf32>,
    %c15_i32_31 = arith.constant 15 : i32
    %79 = tpu.dynamic_rotate %68 by %c15_i32_31 dim 1 : vector<4x256xf32>, i32 -> vector<4x256xf32>
    %80 = vector.extract_strided_slice %2 {offsets = [2, 0], sizes = [1, 256], strides = [1, 1]} : vector<9x256xf32> to vector<1x256xf32>
    %81 = vector.broadcast %80 : vector<1x256xf32> to vector<4x256xf32>
    %82 = arith.mulf %79, %81 : vector<4x256xf32>
    %c8_32 = arith.constant 8 : index
    %c0_33 = arith.constant 0 : index
    %83 = vector.load %arg6[%c8_32, %c0_33] : memref<36x256xf32, #tpu.memory_space<vmem>>, vector<4x256xf32>
    tpu.vector_store %arg6[%c8_32, %c0_33], %82 {strides = array<i32>} : memref<36x256xf32, #tpu.memory_space<vmem>>, vector<4x256xf32>,
    %c1_i32_34 = arith.constant 1 : i32
    %84 = tpu.dynamic_rotate %68 by %c1_i32_34 dim 1 : vector<4x256xf32>, i32 -> vector<4x256xf32>
    %85 = vector.extract_strided_slice %2 {offsets = [3, 0], sizes = [1, 256], strides = [1, 1]} : vector<9x256xf32> to vector<1x256xf32>
    %86 = vector.broadcast %85 : vector<1x256xf32> to vector<4x256xf32>
    %87 = arith.mulf %84, %86 : vector<4x256xf32>
    %c12_35 = arith.constant 12 : index
    %c0_36 = arith.constant 0 : index
    %88 = vector.load %arg6[%c12_35, %c0_36] : memref<36x256xf32, #tpu.memory_space<vmem>>, vector<4x256xf32>
    tpu.vector_store %arg6[%c12_35, %c0_36], %87 {strides = array<i32>} : memref<36x256xf32, #tpu.memory_space<vmem>>, vector<4x256xf32>,
    %c16_37 = arith.constant 16 : index
    %c0_38 = arith.constant 0 : index
    %89 = vector.load %arg6[%c16_37, %c0_38] : memref<36x256xf32, #tpu.memory_space<vmem>>, vector<4x256xf32>
    tpu.vector_store %arg6[%c16_37, %c0_38], %68 {strides = array<i32>} : memref<36x256xf32, #tpu.memory_space<vmem>>, vector<4x256xf32>,
    %c255_i32_39 = arith.constant 255 : i32
    %90 = tpu.dynamic_rotate %68 by %c255_i32_39 dim 1 : vector<4x256xf32>, i32 -> vector<4x256xf32>
    %91 = vector.extract_strided_slice %2 {offsets = [5, 0], sizes = [1, 256], strides = [1, 1]} : vector<9x256xf32> to vector<1x256xf32>
    %92 = vector.broadcast %91 : vector<1x256xf32> to vector<4x256xf32>
    %93 = arith.mulf %90, %92 : vector<4x256xf32>
    %c20_40 = arith.constant 20 : index
    %c0_41 = arith.constant 0 : index
    %94 = vector.load %arg6[%c20_40, %c0_41] : memref<36x256xf32, #tpu.memory_space<vmem>>, vector<4x256xf32>
    tpu.vector_store %arg6[%c20_40, %c0_41], %93 {strides = array<i32>} : memref<36x256xf32, #tpu.memory_space<vmem>>, vector<4x256xf32>,
    %c241_i32_42 = arith.constant 241 : i32
    %95 = tpu.dynamic_rotate %68 by %c241_i32_42 dim 1 : vector<4x256xf32>, i32 -> vector<4x256xf32>
    %96 = vector.extract_strided_slice %2 {offsets = [6, 0], sizes = [1, 256], strides = [1, 1]} : vector<9x256xf32> to vector<1x256xf32>
    %97 = vector.broadcast %96 : vector<1x256xf32> to vector<4x256xf32>
    %98 = arith.mulf %95, %97 : vector<4x256xf32>
    %c24_43 = arith.constant 24 : index
    %c0_44 = arith.constant 0 : index
    %99 = vector.load %arg6[%c24_43, %c0_44] : memref<36x256xf32, #tpu.memory_space<vmem>>, vector<4x256xf32>
    tpu.vector_store %arg6[%c24_43, %c0_44], %98 {strides = array<i32>} : memref<36x256xf32, #tpu.memory_space<vmem>>, vector<4x256xf32>,
    %c240_i32_45 = arith.constant 240 : i32
    %100 = tpu.dynamic_rotate %68 by %c240_i32_45 dim 1 : vector<4x256xf32>, i32 -> vector<4x256xf32>
    %101 = vector.extract_strided_slice %2 {offsets = [7, 0], sizes = [1, 256], strides = [1, 1]} : vector<9x256xf32> to vector<1x256xf32>
    %102 = vector.broadcast %101 : vector<1x256xf32> to vector<4x256xf32>
    %103 = arith.mulf %100, %102 : vector<4x256xf32>
    %c28_46 = arith.constant 28 : index
    %c0_47 = arith.constant 0 : index
    %104 = vector.load %arg6[%c28_46, %c0_47] : memref<36x256xf32, #tpu.memory_space<vmem>>, vector<4x256xf32>
    tpu.vector_store %arg6[%c28_46, %c0_47], %103 {strides = array<i32>} : memref<36x256xf32, #tpu.memory_space<vmem>>, vector<4x256xf32>,
    %c239_i32_48 = arith.constant 239 : i32
    %105 = tpu.dynamic_rotate %68 by %c239_i32_48 dim 1 : vector<4x256xf32>, i32 -> vector<4x256xf32>
    %106 = vector.extract_strided_slice %2 {offsets = [8, 0], sizes = [1, 256], strides = [1, 1]} : vector<9x256xf32> to vector<1x256xf32>
    %107 = vector.broadcast %106 : vector<1x256xf32> to vector<4x256xf32>
    %108 = arith.mulf %105, %107 : vector<4x256xf32>
    %c32_49 = arith.constant 32 : index
    %c0_50 = arith.constant 0 : index
    %109 = vector.load %arg6[%c32_49, %c0_50] : memref<36x256xf32, #tpu.memory_space<vmem>>, vector<4x256xf32>
    tpu.vector_store %arg6[%c32_49, %c0_50], %108 {strides = array<i32>} : memref<36x256xf32, #tpu.memory_space<vmem>>, vector<4x256xf32>,
    %c0_51 = arith.constant 0 : index
    %c0_52 = arith.constant 0 : index
    %110 = vector.load %arg3[%c0_51, %c0_52] : memref<4x36xf32, #tpu.memory_space<vmem>>, vector<4x36xf32>
    %c0_53 = arith.constant 0 : index
    %c0_54 = arith.constant 0 : index
    %111 = vector.load %arg6[%c0_53, %c0_54] : memref<36x256xf32, #tpu.memory_space<vmem>>, vector<36x256xf32>
    %cst_55 = arith.constant dense<0.000000e+00> : vector<4x256xf32>
    %112 = tpu.matmul %110, %111, %cst_55 {dimension_numbers = #tpu.dot_dimension_numbers<[1], [0], [0], [1], [0, 0, 1, 1], [], []>} : vector<4x36xf32>, vector<36x256xf32>, vector<4x256xf32> -> vector<4x256xf32>
    %cst_56 = arith.constant dense<0.000000e+00> : vector<4xf32>
    %113 = vector.multi_reduction <add>, %112, %cst_56 [1] : vector<4x256xf32> to vector<4xf32>
    %114 = vector.shape_cast %113 : vector<4xf32> to vector<4x1xf32>
    %cst_57 = arith.constant 3.906250e-03 : f32
    %115 = vector.broadcast %cst_57 : f32 to vector<4x1xf32>
    %116 = arith.mulf %114, %115 : vector<4x1xf32>
    %117 = vector.broadcast %116 : vector<4x1xf32> to vector<4x256xf32>
    %118 = arith.subf %112, %117 : vector<4x256xf32>
    %119 = arith.mulf %118, %118 : vector<4x256xf32>
    %cst_58 = arith.constant dense<0.000000e+00> : vector<4xf32>
    %120 = vector.multi_reduction <add>, %119, %cst_58 [1] : vector<4x256xf32> to vector<4xf32>
    %121 = vector.shape_cast %120 : vector<4xf32> to vector<4x1xf32>
    %cst_59 = arith.constant 3.906250e-03 : f32
    %122 = vector.broadcast %cst_59 : f32 to vector<4x1xf32>
    %123 = arith.mulf %121, %122 : vector<4x1xf32>
    %cst_60 = arith.constant 9.99999974E-6 : f32
    %124 = vector.broadcast %cst_60 : f32 to vector<4x1xf32>
    %125 = arith.addf %123, %124 : vector<4x1xf32>
    %126 = math.rsqrt %125 : vector<4x1xf32>
    %127 = vector.broadcast %126 : vector<4x1xf32> to vector<4x256xf32>
    %128 = arith.mulf %118, %127 : vector<4x256xf32>
    %cst_61 = arith.constant 0.000000e+00 : f32
    %129 = vector.broadcast %cst_61 : f32 to vector<4x256xf32>
    %130 = arith.cmpf oge, %128, %129 : vector<4x256xf32>
    %cst_62 = arith.constant 2.000000e-01 : f32
    %131 = vector.broadcast %cst_62 : f32 to vector<4x256xf32>
    %132 = arith.mulf %131, %128 : vector<4x256xf32>
    %133 = arith.select %130, %128, %132 : vector<4x256xi1>, vector<4x256xf32>
    %134 = arith.addf %1, %133 : vector<4x256xf32>
    %c0_63 = arith.constant 0 : index
    %c0_64 = arith.constant 0 : index
    %c0_65 = arith.constant 0 : index
    %135 = vector.load %arg5[%c0_63, %c0_64, %c0_65] : memref<1x4x256xf32, #tpu.memory_space<vmem>>, vector<1x4x256xf32>
    %136 = vector.shape_cast %135 : vector<1x4x256xf32> to vector<4x256xf32>
    %137 = vector.shape_cast %134 : vector<4x256xf32> to vector<1x4x256xf32>
    tpu.vector_store %arg5[%c0_63, %c0_64, %c0_65], %137 {strides = array<i32>} : memref<1x4x256xf32, #tpu.memory_space<vmem>>, vector<1x4x256xf32>,
    return
  }
  func.func @transform_0(%arg0: i32) -> (i32, i32, i32) {
    %c0_i32 = arith.constant 0 : i32
    %c0_i32_0 = arith.constant 0 : i32
    %c0_i32_1 = arith.constant 0 : i32
    return %arg0, %c0_i32, %c0_i32_0 : i32, i32, i32
  }
  func.func @transform_1(%arg0: i32) -> (i32, i32) {
    %c0_i32 = arith.constant 0 : i32
    %c0_i32_0 = arith.constant 0 : i32
    %c0_i32_1 = arith.constant 0 : i32
    return %c0_i32, %c0_i32_0 : i32, i32
  }
  func.func @transform_2(%arg0: i32) -> (i32, i32) {
    %c0_i32 = arith.constant 0 : i32
    %c0_i32_0 = arith.constant 0 : i32
    %c0_i32_1 = arith.constant 0 : i32
    return %c0_i32, %c0_i32_0 : i32, i32
  }
  func.func @transform_3(%arg0: i32) -> (i32, i32) {
    %c0_i32 = arith.constant 0 : i32
    %c0_i32_0 = arith.constant 0 : i32
    %c0_i32_1 = arith.constant 0 : i32
    return %c0_i32, %c0_i32_0 : i32, i32
  }
  func.func @transform_4(%arg0: i32) -> (i32, i32, i32) {
    %c0_i32 = arith.constant 0 : i32
    %c0_i32_0 = arith.constant 0 : i32
    %c0_i32_1 = arith.constant 0 : i32
    return %arg0, %c0_i32, %c0_i32_0 : i32, i32, i32
  }
}

</mosaic_0001>

<bundles_post_ra>
// kernel: tpu_custom_call.1
= control target key start
LH: loop header
LB: loop body
LE: loop exit
PB: predicated region body
PF: predicated region fallthrough
CT: control target
= control target key end

     0   :  { %9 = vsyncpa [#allocation4], 0  ;;  %s1670_s0 = inlined_call_operand.hbm [shape: f32[2,4,256], index: 0, kind: input, shape index: {}]   ;;  %s1671_s1 = inlined_call_operand.hbm [shape: f32[4,36], index: 1, kind: input, shape index: {}]   ;;  %s1672_s2 = inlined_call_operand.hbm [shape: f32[4,36], index: 2, kind: input, shape index: {}]   ;;  %s1673_s3 = inlined_call_operand.hbm [shape: f32[9,256], index: 3, kind: input, shape index: {}]   ;;  %s1674_s4 = inlined_call_operand.hbm [shape: f32[2,4,256], index: 4, kind: output, shape index: {}]  }
   0x1   :  { %11 = vsyncpa [#allocation4 + $0x1], 0 }
   0x2   :  { %12 = vsyncpa [#allocation7], 0 }
   0x3   :  { %13 = vsyncpa [#allocation10], 0 }
   0x4   :  { %14 = vsyncpa [#allocation5], 0 }
   0x5   :  { %16 = vsyncpa [#allocation5 + $0x1], 0  ;;  %s1256_s15 = smov 0   ;;  %s1258_s16 = smov 0  }
   0x6   :  { %s1260_s17 = smov 0   ;;  %s1262_s18 = smov 0  }
   0x7 LB: > { %s1277_s19 = sadd.s32 4294967295, %s1213_s18   ;;  %s912_s20 = sadd.s32 4294967294, %s1213_s18   ;;  %s1213_s18 = sphi %s1262_s18, %s1698_s18   ;;  %s1209_s17 = sphi %s1260_s17, %s1697_s17   ;;  %s1205_s16 = sphi %s1258_s16, %s1696_s16   ;;  %s1201_s15 = sphi %s1256_s15, %s1695_s15  }
   0x8   : > { %p42_p0 = scmp.ne.s32.totalorder %s1205_s16, %s1201_s15  ;;  %p1675_p1 = scmp.eq.s32.totalorder %s1277_s19, 0 }
   0x9   : > { %p135_p3 = scmp.eq.s32.totalorder %s912_s20, 1  ;;  %p913_p5 = scmp.ge.s32.totalorder %s1213_s18, 1 }
   0xa   : > { %p1286_p4 = por %p1675_p1, %p42_p0  ;;  %p142_p7 = scmp.lt.s32.totalorder %s1213_s18, 3 }
   0xb   : > { %p1291_p6 = por %p135_p3, %p42_p0  ;;  %s1215_s24 = smov [#allocation6]  }
   0xc   : > { %s1679_s21 = scalar_select %p1286_p4, 1, 0 }
   0xd   : > { %s1680_s22 = scalar_select %p1291_p6, 1, 0 }
   0xe   : > { %p1296_p8 = pnand %p913_p5, %p142_p7  ;;  %s155_s25 = sshll.u32 %s1215_s24, 4  ;;  %s156_s25 = int_to_ptr.vmem [resolvable:$true] %s155_s25 }
   0xf   : > { %s1216_s26 = smov [#allocation8]   ;;  %s1217_s29 = smov [#allocation9]  }
  0x10   : > { %s1681_s23 = scalar_select %p1296_p8, 1, 0 }
  0x11   : > { %p958_p10 = pneg %p1296_p8  ;;  %s166_s27 = sshll.u32 %s1216_s26, 4  ;;  %s167_s27 = int_to_ptr.vmem [resolvable:$true] %s166_s27 }
  0x12   : > { %s176_s30 = sshll.u32 %s1217_s29, 4  ;;  %s1046_s5 = scalar_lea.vmem %s156_s25, 64  ;;  %s1309_s30 = int_to_ptr.vmem [resolvable:$true] %s176_s30 }
  0x13   : > { %p1305_p11 = pnand %p958_p10, %p1675_p1  ;;  %p1047_p13 = scmp.ne.s32.totalorder %s156_s25, %s1046_s5 }
  0x14   : > { %p1054_p5 = scmp.lt.s32.totalorder %s156_s25, %s156_s25  ;;  %p1055_p7 = scmp.lt.s32.totalorder %s1046_s5, %s1046_s5 }
  0x15   : > { %p1037_p12 = pneg %p1305_p11 }
  0x16   : > { %p1056_p10 = por %p1055_p7, %p1054_p5 }
  0x17   : > { %p1049_p0 = pnand %p1047_p13, %p1037_p12 }
  0x19   : > { %p1050_p3 = pneg %p1049_p0 }
  0x1b   : > { %p1057_p9 = pnand %p1056_p10, %p1050_p3 }
  0x1d   : > { %1060 = shalt.err (!%p1057_p9)
}
  0x1e   : > { %961 = dma.hbm_to_vmem [thread:$0]  (!%p1305_p11), %s1671_s1, 64, %s156_s25, [#allocation7]  }
  0x1f   : > { %s1072_s8 = scalar_lea.vmem %s167_s27, 64  ;;  %p1080_p13 = scmp.lt.s32.totalorder %s167_s27, %s167_s27 }
  0x20   : > { %p1073_p1 = scmp.ne.s32.totalorder %s167_s27, %s1072_s8  ;;  %p1081_p0 = scmp.lt.s32.totalorder %s1072_s8, %s1072_s8 }
  0x22   : > { %p1075_p2 = pnand %p1073_p1, %p1037_p12  ;;  %p1082_p4 = por %p1081_p0, %p1080_p13 }
  0x24   : > { %p1076_p6 = pneg %p1075_p2 }
  0x26   : > { %p1083_p8 = pnand %p1082_p4, %p1076_p6 }
  0x28   : > { %1086 = shalt.err (!%p1083_p8)
}
  0x29   : > { %964 = dma.hbm_to_vmem [thread:$0]  (!%p1305_p11), %s1672_s2, 64, %s167_s27, [#allocation7]  }
  0x2a   : > { %s1098_s11 = scalar_lea.vmem %s1309_s30, 512  ;;  %p1106_p3 = scmp.lt.s32.totalorder %s1309_s30, %s1309_s30 }
  0x2b   : > { %p1099_p9 = scmp.ne.s32.totalorder %s1309_s30, %s1098_s11  ;;  %p1107_p4 = scmp.lt.s32.totalorder %s1098_s11, %s1098_s11 }
  0x2d   : > { %p1101_p1 = pnand %p1099_p9, %p1037_p12  ;;  %p1108_p6 = por %p1107_p4, %p1106_p3 }
  0x2f   : > { %p1102_p2 = pneg %p1101_p1 }
  0x31   : > { %p1109_p8 = pnand %p1108_p6, %p1102_p2 }
  0x33   : > { %1112 = shalt.err (!%p1109_p8)
}
  0x34   : > { %s1218_s12 = smov 256   ;;  %s1219_s13 = smov 16  }
  0x35   : > { %967 = dma.hbm_to_vmem [thread:$0]  (!%p1305_p11), %s1673_s3, 512, %s1309_s30, [#allocation10], %s1218_s12, %s1218_s12, %s1219_s13  }
  0x36   : > { %s1343_s24 = sadd.s32 1, %s1213_s18   ;;  %s29_s26 = sadd.s32 1, %s1209_s17 }
  0x37   : > { %s26_s25 = ssub.s32 %s1213_s18, %s1343_s24  ;;  %p36_p5 = scmp.ne.s32.totalorder %s1209_s17, %s1205_s16 }
  0x38   : > { %p27_p12 = scmp.eq.s32.totalorder %s26_s25, 0  ;;  %p37_p7 = scmp.eq.s32.totalorder %s1213_s18, 0 }
  0x39   : > { %p979_p10 = scmp.lt.s32.totalorder %s1213_s18, 2  ;;  %p1683_p0 = scmp.eq.s32.totalorder %s1277_s19, 1 }
  0x3a   : > { %s1353_s27 = scalar_select %p27_p12, %s1209_s17, %s29_s26  }
  0x3b   : > { %p38_p13 = por %p37_p7, %p36_p5  ;;  %p1357_p9 = por %p1683_p0, %p36_p5 }
  0x3c   : > { %s190_s28 = sand.u32 1, %s1209_s17   ;;  %s940_s5 = sshll.u32 %s1213_s18, 7 }
  0x3d   : > { %s1684_s29 = scalar_select %p1357_p9, 1, 0 }
  0x3e   : > { %s918_s30 = sshll.u32 %s190_s28, 3  ;;  %s1366_s8 = scalar_lea.hbm %s1670_s0, %s940_s5 }
  0x3f   : > { %s194_s9 = scalar_lea.vmem [#allocation3], %s918_s30  ;;  %p1368_p11 = pnand %p979_p10, %p38_p13 }
  0x40   : > { %s202_s10 = sshll.u32 %s194_s9, 4  ;;  %s191_s12 = scalar_lea.sflag [#allocation4], %s190_s28  ;;  %s203_s10 = int_to_ptr.vmem [resolvable:$true] %s202_s10 }
  0x41   : > { %s1113_s13 = scalar_lea.hbm %s1366_s8, 128  ;;  %p1115_p2 = pneg %p1368_p11 }
  0x42   : > { %p1114_p1 = scmp.ne.s32.totalorder %s1366_s8, %s1113_s13  ;;  %s1118_s25 = scalar_lea.hbm %s1670_s0, 256 }
  0x43   : > { %p1119_p6 = scmp.lt.s32.totalorder %s1366_s8, %s1670_s0  ;;  %p1120_p8 = scmp.lt.s32.totalorder %s1118_s25, %s1113_s13 }
  0x44   : > { %p1116_p3 = pnand %p1115_p2, %p1114_p1 }
  0x45   : > { %p1121_p12 = por %p1120_p8, %p1119_p6 }
  0x46   : > { %p1117_p4 = pneg %p1116_p3 }
  0x48   : > { %p1122_p5 = pnand %p1121_p12, %p1117_p4 }
  0x4a   : > { %1125 = shalt.err (!%p1122_p5)
}
  0x4b   : > { %s1126_s30 = scalar_lea.vmem %s203_s10, 128  ;;  %s1220_s28 = smov [#allocation3]  }
  0x4c   : > { %p1127_p7 = scmp.ne.s32.totalorder %s203_s10, %s1126_s30  ;;  %s1131_s6 = sshll.u32 %s1220_s28, 4  ;;  %s1132_s6 = int_to_ptr.vmem [resolvable:$false] %s1131_s6 }
  0x4d   : > { %s1133_s7 = scalar_lea.vmem %s1132_s6, 256  ;;  %p1134_p0 = scmp.lt.s32.totalorder %s203_s10, %s1132_s6 }
  0x4e   : > { %p1129_p10 = pnand %p1127_p7, %p1115_p2  ;;  %p1135_p1 = scmp.lt.s32.totalorder %s1133_s7, %s1126_s30 }
  0x50   : > { %p1130_p13 = pneg %p1129_p10  ;;  %p1136_p3 = por %p1135_p1, %p1134_p0 }
  0x52   : > { %p1137_p9 = pnand %p1136_p3, %p1130_p13 }
  0x54   : > { %1140 = shalt.err (!%p1137_p9)
}
  0x55   : > { %971 = dma.hbm_to_vmem [thread:$0]  (!%p1368_p11), %s1366_s8, 128, %s203_s10, %s191_s12  }
  0x56   : > { %p1686_p4 = scmp.ne.s32.totalorder %s1681_s23, 0 }
  0x57   : > { %s1389_s9 = sand.u32 (!%p1686_p4), 1, %s1205_s16   ;;  %p1687_p2 = scmp.ne.s32.totalorder (!%p1686_p4), %s1679_s21, 0 }
  0x58   : > { %211 = sbr.rel (%p1686_p4) target bundleno = 1448 (0x5a8), region = 36  ;;  %s922_s13 = sshll.u32 (!%p1686_p4), %s1389_s9, 3 }
  0x59   : > { %s214_s14 = scalar_lea.sflag (!%p1686_p4), [#allocation4], %s1389_s9  ;;  %s217_s20 = scalar_lea.vmem (!%p1686_p4), [#allocation3], %s922_s13 }
  0x5d   : > { %1184 = dma.done.wait (%p1687_p2), %s214_s14, 128  }
  0x5e   : > { %1186 = vsyncadd (%p1687_p2), %s214_s14, 4294967168  ;;  %p1688_p9 = scmp.eq.s32.totalorder %s1277_s19, 0 }
  0x60   : > { %1188 = dma.done.wait (%p1688_p9), [#allocation7], 128   ;;  %p1689_p11 = pmov %p1688_p9 }
  0x61   : > { %p1690_p6 = pmov %p1688_p9 }
  0x62   : > { %1190 = vsyncadd (%p1689_p11), [#allocation7], 4294967168 }
  0x63   : > { %1192 = dma.done.wait (%p1690_p6), [#allocation10], 512   ;;  %p1691_p8 = pmov %p1690_p6 }
  0x64   : > { %v1407_v0 = vld [vmem:[%s217_s20] sm:$0xff]  ;;  %s1221_s23 = smov 111   ;;  %s1222_s21 = smov 112   ;;  %v1228_v2 = vmov 0.0   ;;  %v266_v3 = vlaneseq  ;;  %v1442_v9 = vld [vmem:[#allocation9] sm:$0xff]  ;;  %vm457_vm4 = vcmask 1043456  }
  0x65   : > { %1194 = vsyncadd (%p1691_p8), [#allocation10], 4294966784  ;;  %423 = vrot.lane.b32.xlu1 %v1407_v0, %s1221_s23  ;;  %352 = vst [vmem:[#allocation2 + $0x48] sm:$0xf] %v1407_v0  ;;  %398 = vrot.lane.b32.xlu0 %v1407_v0, %s1222_s21  ;;  %v260_v1 = vcombine.high %v1407_v0, %v1407_v0  ;;  %s1223_s8 = smov 127   ;;  %s1224_s10 = smov 113  }
  0x66   : > { %s1225_s11 = smov 1   ;;  %s1226_s12 = smov 16   ;;  %528 = vmatprep.mubr.f32.mxu0 %v1228_v2  ;;  %759 = vmatprep.mubr.f32.mxu1 %v1228_v2  ;;  %v1436_v4 = vshrl.u32 %v266_v3, 7  ;;  %v1438_v5 = vand.u32 127, %v266_v3  ;;  %v1444_v10 = vld [vmem:[#allocation9 + $0x8] sm:$0xff]  ;;  %vm453_vm9 = vcmask 293888  }
  0x67   : > { %353 = vst [vmem:[#allocation2 + $0x28] sm:$0xf] %v260_v1  ;;  %s1227_s25 = smov 15   ;;  %s1229_s26 = smov 17   ;;  %v1447_v12 = vld [vmem:[#allocation9 + $0x10] ss:$0 sm:$0xff] }
  0x68   : > { %v363_v8 = vsub.s32 5, %v1436_v4  ;;  %vm427_vm0 = vcmp.lt.s32.totalorder %v1438_v5, 111  ;;  %v407_v11 = vsub.s32 7, %v1436_v4  ;;  %v1449_v13 = vld [vmem:[#allocation9 + $0x18] ss:$0 sm:$0xff]  ;;  %vm358_vm1 = vcmp.lt.s32.totalorder %v1438_v5, 127 }
  0x69   : > { %354 = vrot.lane.b32.xlu0 %v1407_v0, %s1223_s8  ;;  %425 = vrot.lane.b32.xlu1 %v260_v1, %s1221_s23  ;;  %vm402_vm2 = vcmp.lt.s32.totalorder %v1438_v5, 112  ;;  %v388_v16 = vsub.s32 6, %v1436_v4  ;;  %vm383_vm3 = vcmp.lt.s32.totalorder %v1438_v5, 113  ;;  %v336_v29 = vsub.s32 3, %v1436_v4  ;;  %s941_s5 = sshll.u32 %s1277_s19, 7  ;;  %s253_s30 = scalar_lea.vmem [#allocation11], %s922_s13 }
  0x6a   : > { %v1459_v19 = vrot.slane %v1442_v9, %v363_v8  ;;  %v1462_v20 = vrot.slane %v1444_v10, %v363_v8  ;;  %v1467_v23 = vrot.slane %v1442_v9, %v407_v11  ;;  %v1470_v24 = vrot.slane %v1444_v10, %v407_v11  ;;  %s813_s28 = sshll.u32 %s253_s30, 4  ;;  %s811_s14 = scalar_lea.hbm %s1674_s4, %s941_s5  ;;  %s814_s28 = int_to_ptr.vmem [resolvable:$true] %s813_s28 }
  0x6b   : > { %v1474_v27 = vrot.slane %v1442_v9, %v388_v16  ;;  %v1477_v28 = vrot.slane %v1444_v10, %v388_v16  ;;  %vm331_vm5 = vcmp.lt.s32.totalorder %v1438_v5, 1  ;;  %v1498_v46 = vrot.slane %v1442_v9, %v336_v29  ;;  %s799_s20 = scalar_lea.sflag [#allocation5], %s1389_s9  ;;  %p1692_p5 = scmp.ne.s32.totalorder %s1684_s29, 0 }
  0x6c   : > { %v1503_v49 = vrot.slane %v1444_v10, %v336_v29  ;;  %v292_v50 = vsub.s32 1, %v1436_v4  ;;  %vm287_vm6 = vcmp.lt.s32.totalorder %v1438_v5, 16  ;;  %v317_v57 = vsub.s32 2, %v1436_v4 }
  0x6d   : > { %356 = vrot.lane.b32.xlu1 %v260_v1, %s1223_s8  ;;  %400 = vrot.lane.b32.xlu0 %v260_v1, %s1222_s21  ;;  %vm312_vm7 = vcmp.lt.s32.totalorder %v1438_v5, 15  ;;  %vm268_vm8 = vcmp.lt.s32.totalorder %v1438_v5, 17 }
  0x6e   : > { %v1517_v60 = vrot.slane %v1442_v9, %v292_v50  ;;  %v1520_v61 = vrot.slane %v1444_v10, %v292_v50 }
  0x71   : > { %381 = vrot.lane.b32.xlu1 %v260_v1, %s1224_s10  ;;  %379 = vrot.lane.b32.xlu0 %v1407_v0, %s1224_s10 }
  0x75   : > { %329 = vrot.lane.b32.xlu1 %v260_v1, %s1225_s11  ;;  %327 = vrot.lane.b32.xlu0 %v1407_v0, %s1225_s11 }
  0x79   : > { %285 = vrot.lane.b32.xlu1 %v260_v1, %s1226_s12  ;;  %283 = vrot.lane.b32.xlu0 %v1407_v0, %s1226_s12 }
  0x7d   : > { %310 = vrot.lane.b32.xlu1 %v260_v1, %s1227_s25  ;;  %308 = vrot.lane.b32.xlu0 %v1407_v0, %s1227_s25 }
  0x81   : > { %264 = vrot.lane.b32.xlu1 %v260_v1, %s1229_s26  ;;  %262 = vrot.lane.b32.xlu0 %v1407_v0, %s1229_s26 }
  0xd7   : > { %v424_v6 = vpop.permute.xlu1 %423  ;;  %v399_v7 = vpop.permute.xlu0 %398 }
  0xdb   : > { %v355_v14 = vpop.permute.xlu0 %354  ;;  %v426_v15 = vpop.permute.xlu1 %425 }
  0xdc   : > { %v428_v17 = vsel %vm427_vm0, %v424_v6, %v426_v15  ;;  %v429_v18 = vsel %vm427_vm0, %v426_v15, %v424_v6  ;;  %v273_v15 = vsub.s32 0, %v1436_v4 }
  0xdd   : > { %v438_v21 = vmul.f32 %v1447_v12, %v428_v17  ;;  %v439_v22 = vmul.f32 %v1449_v13, %v429_v18 }
  0xdf   : > { %440 = vst [vmem:[#allocation2 + $0x40] sm:$0xf] %v438_v21  ;;  %441 = vst [vmem:[#allocation2 + $0x38] sm:$0xf] %v439_v22  ;;  %v357_v25 = vpop.permute.xlu1 %356  ;;  %v401_v26 = vpop.permute.xlu0 %400 }
  0xe0   : > { %v359_v30 = vsel %vm358_vm1, %v355_v14, %v357_v25  ;;  %v360_v31 = vsel %vm358_vm1, %v357_v25, %v355_v14  ;;  %v403_v32 = vsel %vm402_vm2, %v399_v7, %v401_v26  ;;  %v404_v33 = vsel %vm402_vm2, %v401_v26, %v399_v7 }
  0xe1   : > { %v369_v34 = vmul.f32 %v1459_v19, %v359_v30  ;;  %v370_v35 = vmul.f32 %v1462_v20, %v360_v31  ;;  %v413_v36 = vmul.f32 %v1467_v23, %v403_v32  ;;  %v414_v37 = vmul.f32 %v1470_v24, %v404_v33 }
  0xe2   : > { %v1528_v7 = vrot.slane %v1442_v9, %v317_v57  ;;  %v1533_v14 = vrot.slane %v1444_v10, %v317_v57  ;;  %v1544_v33 = vrot.slane %v1442_v9, %v273_v15 }
  0xe3   : > { %v373_v38 = vrot.slane %v369_v34, 4  ;;  %v374_v39 = vrot.slane %v370_v35, 4  ;;  %v417_v40 = vrot.slane %v413_v36, 4  ;;  %v418_v41 = vrot.slane %v414_v37, 4  ;;  %v382_v42 = vpop.permute.xlu1 %381  ;;  %v380_v43 = vpop.permute.xlu0 %379 }
  0xe4   : > { %v384_v44 = vsel %vm383_vm3, %v380_v43, %v382_v42  ;;  %v385_v45 = vsel %vm383_vm3, %v382_v42, %v380_v43  ;;  %v1547_v34 = vrot.slane %v1444_v10, %v273_v15  ;;  %v442_v43 = vld [vmem:[#allocation6] sm:$0xf] }
  0xe5   : > { %377 = vst [vmem:[#allocation2 + $0x48] sm:$0xf0] %v373_v38  ;;  %378 = vst [vmem:[#allocation2 + $0x28] sm:$0xf0] %v374_v39  ;;  %v394_v47 = vmul.f32 %v1474_v27, %v384_v44  ;;  %v395_v48 = vmul.f32 %v1477_v28, %v385_v45 }
  0xe6   : > { %421 = vst [vmem:[#allocation2 + $0x8] sm:$0xf0] %v417_v40  ;;  %422 = vst [vmem:[#allocation2 + $0x20] sm:$0xf0] %v418_v41  ;;  %v452_v51 = vld [vmem:[#allocation2 + $0x38] sm:$0xf] }
  0xe7   : > { %v451_v52 = vld [vmem:[#allocation2 + $0x40] sm:$0xf]  ;;  %396 = vst [vmem:[#allocation2 + $0x8] sm:$0xf] %v394_v47  ;;  %397 = vst [vmem:[#allocation2 + $0x20] sm:$0xf] %v395_v48  ;;  %929 = vmatprep.subr.msk.mxu0 %vm457_vm4, %v452_v51  ;;  %v330_v53 = vpop.permute.xlu1 %329  ;;  %v328_v54 = vpop.permute.xlu0 %327 }
  0xe8   : > { %v332_v55 = vsel %vm331_vm5, %v328_v54, %v330_v53  ;;  %v333_v56 = vsel %vm331_vm5, %v330_v53, %v328_v54  ;;  %930 = vmatpush1.msk.msra.mxu0 %vm457_vm4, %v451_v52 }
  0xe9   : > { %v342_v58 = vmul.f32 %v1498_v46, %v333_v56  ;;  %v343_v59 = vmul.f32 %v1503_v49, %v332_v55 }
  0xeb   : > { %v346_v62 = vrot.slane %v342_v58, 4  ;;  %v347_v63 = vrot.slane %v343_v59, 4  ;;  %v286_v1 = vpop.permute.xlu1 %285  ;;  %v284_v2 = vpop.permute.xlu0 %283 }
  0xec   : > { %v288_v3 = vsel %vm287_vm6, %v284_v2, %v286_v1  ;;  %v289_v6 = vsel %vm287_vm6, %v286_v1, %v284_v2  ;;  %v448_v30 = vld [vmem:[#allocation2 + $0x28] sm:$0xff] }
  0xed   : > { %350 = vst [vmem:[#allocation2 + $0x18] sm:$0xf0] %v346_v62  ;;  %351 = vst [vmem:[#allocation2 + $0x10] sm:$0xf0] %v347_v63  ;;  %v298_v8 = vmul.f32 %v1517_v60, %v289_v6  ;;  %v299_v11 = vmul.f32 %v1520_v61, %v288_v3  ;;  %v447_v32 = vld [vmem:[#allocation2 + $0x48] sm:$0xff] }
  0xee   : > { %v450_v16 = vld [vmem:[#allocation2 + $0x20] sm:$0xff]  ;;  %v449_v17 = vld [vmem:[#allocation2 + $0x8] sm:$0xff] }
  0xef   : > { %v302_v18 = vrot.slane %v298_v8, 4  ;;  %v303_v21 = vrot.slane %v299_v11, 4  ;;  %v311_v22 = vpop.permute.xlu1 %310  ;;  %488 = vmatprep.subr.mxu0 %v450_v16  ;;  %v309_v25 = vpop.permute.xlu0 %308 }
  0xf0   : > { %v313_v26 = vsel %vm312_vm7, %v309_v25, %v311_v22  ;;  %v314_v29 = vsel %vm312_vm7, %v311_v22, %v309_v25  ;;  %489 = vmatpush1.msra.mxu0 %v449_v17 }
  0xf1   : > { %306 = vst [vmem:[#allocation2 + $0x30] sm:$0xf0] %v302_v18  ;;  %307 = vst [vmem:[#allocation2] sm:$0xf0] %v303_v21  ;;  %v323_v4 = vmul.f32 %v1528_v7, %v314_v29  ;;  %v324_v31 = vmul.f32 %v1533_v14, %v313_v26  ;;  %490 = vmatprep.subr.mxu0 %v448_v30 }
  0xf2   : > { %491 = vmatpush1.msra.mxu0 %v447_v32 }
  0xf3   : > { %325 = vst [vmem:[#allocation2 + $0x18] sm:$0xf] %v323_v4  ;;  %326 = vst [vmem:[#allocation2 + $0x10] sm:$0xf] %v324_v31  ;;  %v265_v35 = vpop.permute.xlu1 %264  ;;  %v263_v36 = vpop.permute.xlu0 %262 }
  0xf4   : > { %v269_v37 = vsel %vm268_vm8, %v263_v36, %v265_v35  ;;  %v270_v38 = vsel %vm268_vm8, %v265_v35, %v263_v36 }
  0xf5   : > { %v279_v39 = vmul.f32 %v1544_v33, %v270_v38  ;;  %v280_v40 = vmul.f32 %v1547_v34, %v269_v37 }
  0xf7   : > { %281 = vst [vmem:[#allocation2 + $0x30] sm:$0xf] %v279_v39  ;;  %282 = vst [vmem:[#allocation2] sm:$0xf] %v280_v40 }
  0xfa   : > { %v446_v9 = vld [vmem:[#allocation2 + $0x10] sm:$0xff]  ;;  %v445_v10 = vld [vmem:[#allocation2 + $0x18] sm:$0xff] }
  0xfb   : > { %492 = vmatprep.subr.mxu0 %v446_v9 }
  0xfc   : > { %493 = vmatpush1.msra.mxu0 %v445_v10 }
  0xfe   : > { %v444_v41 = vld [vmem:[#allocation2] sm:$0xff]  ;;  %v443_v42 = vld [vmem:[#allocation2 + $0x30] sm:$0xff] }
  0xff   : > { %494 = vmatprep.subr.mxu0 %v444_v41 }
 0x100   : > { %495 = vmatpush1.msra.mxu0 %v443_v42 }
 0x101   : > { %931 = vmatmul.mubr.msk.f32.vlgmr.msra.gmra.mxu0 %vm453_vm9, %v442_v43 }
 0x1c1   : > { %v530_v44 = vpop.f32.mrf.mxu0 }
 0x1c2   : > { %v535_v47 = vsel %vm457_vm4, %v530_v44, 0.0 }
 0x1c3   : > { %v532_v45 = vpop.f32.mrf.mxu0 }
 0x1c4   : > { %v536_v48 = vsel %vm457_vm4, %v532_v45, 0.0 }
 0x1c5   : > { %v537_v50 = vadd.f32 %v536_v48, %v535_v47 }
 0x1c7   : > { %538 = vadd.xlane.f32.xlu0 %v537_v50 }
 0x250   : > { %v539_v51 = vpop.xlane.xlu0 %538 }
 0x251   : > { %v540_v52 = vmul.f32 0.00390625, %v539_v51 }
 0x253   : > { %v541_v53 = vsub.f32 %v530_v44, %v540_v52  ;;  %v542_v54 = vsub.f32 %v532_v45, %v540_v52 }
 0x255   : > { %v543_v55 = vmul.f32 %v541_v53, %v541_v53  ;;  %v544_v56 = vmul.f32 %v542_v54, %v542_v54 }
 0x257   : > { %v545_v57 = vsel %vm457_vm4, %v543_v55, 0.0  ;;  %v546_v58 = vsel %vm457_vm4, %v544_v56, 0.0 }
 0x258   : > { %v547_v59 = vadd.f32 %v546_v58, %v545_v57 }
 0x25a   : > { %548 = vadd.xlane.f32.xlu1 %v547_v59 }
 0x2e3   : > { %v549_v62 = vpop.xlane.xlu1 %548 }
 0x2e4   : > { %v550_v63 = vmul.f32 0.00390625, %v549_v62 }
 0x2e6   : > { %v551_v1 = vadd.f32 1e-05, %v550_v63 }
 0x2e8   : > { %1031 = vrsqrt.f32 %v551_v1 }
 0x2f5   : > { %v1032_v2 = vpop.eup %1031 }
 0x2f6   : > { %v553_v3 = vmul.f32 %v1032_v2, %v541_v53  ;;  %v554_v6 = vmul.f32 %v1032_v2, %v542_v54 }
 0x2f8   : > { %vm555_vm10 = vcmp.ge.f32.partialorder %v553_v3, 0.0  ;;  %vm556_vm11 = vcmp.ge.f32.partialorder %v554_v6, 0.0  ;;  %v557_v8 = vmul.f32 0.2, %v553_v3  ;;  %v558_v11 = vmul.f32 0.2, %v554_v6 }
 0x2fa   : > { %v559_v15 = vsel %vm555_vm10, %v553_v3, %v557_v8  ;;  %v560_v16 = vsel %vm556_vm11, %v554_v6, %v558_v11 }
 0x2fb   : > { %v563_v17 = vcombine.low %v559_v15, %v560_v16 }
 0x2fd   : > { %v565_v18 = vadd.f32 %v563_v17, %v1407_v0 }
 0x2ff   : > { %621 = vst [vmem:[#allocation2 + $0x48] sm:$0xf] %v565_v18  ;;  %649 = vrot.lane.b32.xlu0 %v565_v18, %s1222_s21  ;;  %v567_v21 = vcombine.high %v565_v18, %v565_v18 }
 0x301   : > { %651 = vrot.lane.b32.xlu1 %v567_v21, %s1222_s21  ;;  %622 = vst [vmem:[#allocation2 + $0x28] sm:$0xf] %v567_v21  ;;  %s1230_s21 = smov [#allocation11]  }
 0x302   : > { %s1145_s19 = sshll.u32 %s1230_s21, 4  ;;  %s1146_s19 = int_to_ptr.vmem [resolvable:$false] %s1145_s19 }
 0x303   : > { %665 = vrot.lane.b32.xlu0 %v565_v18, %s1221_s23  ;;  %s1147_s13 = scalar_lea.vmem %s1146_s19, 256  ;;  %p1148_p13 = scmp.lt.s32.totalorder %s814_s28, %s1146_s19 }
 0x305   : > { %667 = vrot.lane.b32.xlu1 %v567_v21, %s1221_s23  ;;  %s1141_s23 = scalar_lea.vmem %s814_s28, 128 }
 0x306   : > { %p1142_p12 = scmp.ne.s32.totalorder %s814_s28, %s1141_s23  ;;  %p1149_p0 = scmp.lt.s32.totalorder %s1147_s13, %s1141_s23 }
 0x307   : > { %623 = vrot.lane.b32.xlu0 %v565_v18, %s1223_s8 }
 0x308   : > { %p1143_p7 = pnand %p1142_p12, %p1692_p5  ;;  %p1150_p1 = por %p1149_p0, %p1148_p13 }
 0x309   : > { %625 = vrot.lane.b32.xlu1 %v567_v21, %s1223_s8 }
 0x30a   : > { %p1144_p10 = pneg %p1143_p7 }
 0x30b   : > { %639 = vrot.lane.b32.xlu0 %v565_v18, %s1224_s10 }
 0x30c   : > { %p1151_p3 = pnand %p1150_p1, %p1144_p10 }
 0x30d   : > { %641 = vrot.lane.b32.xlu1 %v567_v21, %s1224_s10 }
 0x30f   : > { %605 = vrot.lane.b32.xlu0 %v565_v18, %s1225_s11 }
 0x311   : > { %607 = vrot.lane.b32.xlu1 %v567_v21, %s1225_s11 }
 0x313   : > { %579 = vrot.lane.b32.xlu0 %v565_v18, %s1226_s12 }
 0x315   : > { %581 = vrot.lane.b32.xlu1 %v567_v21, %s1226_s12 }
 0x317   : > { %595 = vrot.lane.b32.xlu0 %v565_v18, %s1227_s25 }
 0x319   : > { %597 = vrot.lane.b32.xlu1 %v567_v21, %s1227_s25 }
 0x31b   : > { %569 = vrot.lane.b32.xlu0 %v565_v18, %s1229_s26 }
 0x31d   : > { %571 = vrot.lane.b32.xlu1 %v567_v21, %s1229_s26 }
 0x371   : > { %v650_v22 = vpop.permute.xlu0 %649 }
 0x373   : > { %v652_v25 = vpop.permute.xlu1 %651 }
 0x374   : > { %v653_v26 = vsel %vm402_vm2, %v650_v22, %v652_v25  ;;  %v654_v29 = vsel %vm402_vm2, %v652_v25, %v650_v22 }
 0x375   : > { %v655_v30 = vmul.f32 %v653_v26, %v1467_v23  ;;  %v656_v4 = vmul.f32 %v654_v29, %v1470_v24  ;;  %v666_v31 = vpop.permute.xlu0 %665 }
 0x377   : > { %v659_v32 = vrot.slane %v655_v30, 4  ;;  %v660_v35 = vrot.slane %v656_v4, 4  ;;  %v668_v36 = vpop.permute.xlu1 %667 }
 0x378   : > { %v669_v37 = vsel %vm427_vm0, %v666_v31, %v668_v36  ;;  %v670_v38 = vsel %vm427_vm0, %v668_v36, %v666_v31  ;;  %v675_v31 = vld [vmem:[#allocation8] sm:$0xf] }
 0x379   : > { %663 = vst [vmem:[#allocation2 + $0x8] sm:$0xf0] %v659_v32  ;;  %664 = vst [vmem:[#allocation2 + $0x20] sm:$0xf0] %v660_v35  ;;  %v671_v39 = vmul.f32 %v1447_v12, %v669_v37  ;;  %v672_v40 = vmul.f32 %v1449_v13, %v670_v38  ;;  %v624_v9 = vpop.permute.xlu0 %623 }
 0x37b   : > { %673 = vst [vmem:[#allocation2 + $0x40] sm:$0xf] %v671_v39  ;;  %674 = vst [vmem:[#allocation2 + $0x38] sm:$0xf] %v672_v40  ;;  %v626_v23 = vpop.permute.xlu1 %625 }
 0x37c   : > { %v627_v24 = vsel %vm358_vm1, %v624_v9, %v626_v23  ;;  %v628_v10 = vsel %vm358_vm1, %v626_v23, %v624_v9 }
 0x37d   : > { %v629_v41 = vmul.f32 %v627_v24, %v1459_v19  ;;  %v630_v42 = vmul.f32 %v628_v10, %v1462_v20  ;;  %v640_v43 = vpop.permute.xlu0 %639 }
 0x37f   : > { %v633_v44 = vrot.slane %v629_v41, 4  ;;  %v634_v45 = vrot.slane %v630_v42, 4  ;;  %v642_v12 = vpop.permute.xlu1 %641 }
 0x380   : > { %v643_v13 = vsel %vm383_vm3, %v640_v43, %v642_v12  ;;  %v644_v47 = vsel %vm383_vm3, %v642_v12, %v640_v43 }
 0x381   : > { %637 = vst [vmem:[#allocation2 + $0x48] sm:$0xf0] %v633_v44  ;;  %638 = vst [vmem:[#allocation2 + $0x28] sm:$0xf0] %v634_v45  ;;  %v645_v48 = vmul.f32 %v643_v13, %v1474_v27  ;;  %v646_v50 = vmul.f32 %v644_v47, %v1477_v28  ;;  %v606_v51 = vpop.permute.xlu0 %605 }
 0x382   : > { %v685_v19 = vld [vmem:[#allocation2 + $0x38] sm:$0xf]  ;;  %v684_v52 = vld [vmem:[#allocation2 + $0x40] sm:$0xf] }
 0x383   : > { %647 = vst [vmem:[#allocation2 + $0x8] sm:$0xf] %v645_v48  ;;  %648 = vst [vmem:[#allocation2 + $0x20] sm:$0xf] %v646_v50  ;;  %932 = vmatprep.subr.msk.mxu1 %vm457_vm4, %v685_v19  ;;  %v608_v20 = vpop.permute.xlu1 %607 }
 0x384   : > { %v609_v53 = vsel %vm331_vm5, %v606_v51, %v608_v20  ;;  %v610_v54 = vsel %vm331_vm5, %v608_v20, %v606_v51  ;;  %933 = vmatpush1.msk.msra.mxu1 %vm457_vm4, %v684_v52 }
 0x385   : > { %v611_v27 = vmul.f32 %v610_v54, %v1498_v46  ;;  %v612_v28 = vmul.f32 %v609_v53, %v1503_v49  ;;  %v580_v55 = vpop.permute.xlu0 %579 }
 0x387   : > { %v615_v56 = vrot.slane %v611_v27, 4  ;;  %v616_v57 = vrot.slane %v612_v28, 4  ;;  %v582_v58 = vpop.permute.xlu1 %581 }
 0x388   : > { %v583_v59 = vsel %vm287_vm6, %v580_v55, %v582_v58  ;;  %v584_v62 = vsel %vm287_vm6, %v582_v58, %v580_v55  ;;  %v681_v16 = vld [vmem:[#allocation2 + $0x28] sm:$0xff] }
 0x389   : > { %619 = vst [vmem:[#allocation2 + $0x18] sm:$0xf0] %v615_v56  ;;  %620 = vst [vmem:[#allocation2 + $0x10] sm:$0xf0] %v616_v57  ;;  %v585_v63 = vmul.f32 %v584_v62, %v1517_v60  ;;  %v586_v1 = vmul.f32 %v583_v59, %v1520_v61  ;;  %v596_v2 = vpop.permute.xlu0 %595  ;;  %v680_v17 = vld [vmem:[#allocation2 + $0x48] sm:$0xff] }
 0x38a   : > { %v683_v46 = vld [vmem:[#allocation2 + $0x20] sm:$0xff]  ;;  %v682_v3 = vld [vmem:[#allocation2 + $0x8] sm:$0xff] }
 0x38b   : > { %v589_v49 = vrot.slane %v585_v63, 4  ;;  %v590_v6 = vrot.slane %v586_v1, 4  ;;  %719 = vmatprep.subr.mxu1 %v683_v46  ;;  %v598_v8 = vpop.permute.xlu1 %597 }
 0x38c   : > { %v599_v11 = vsel %vm312_vm7, %v596_v2, %v598_v8  ;;  %v600_v15 = vsel %vm312_vm7, %v598_v8, %v596_v2  ;;  %720 = vmatpush1.msra.mxu1 %v682_v3 }
 0x38d   : > { %593 = vst [vmem:[#allocation2 + $0x30] sm:$0xf0] %v589_v49  ;;  %594 = vst [vmem:[#allocation2] sm:$0xf0] %v590_v6  ;;  %v601_v60 = vmul.f32 %v600_v15, %v1528_v7  ;;  %v602_v61 = vmul.f32 %v599_v11, %v1533_v14  ;;  %721 = vmatprep.subr.mxu1 %v681_v16  ;;  %v570_v18 = vpop.permute.xlu0 %569 }
 0x38e   : > { %722 = vmatpush1.msra.mxu1 %v680_v17 }
 0x38f   : > { %603 = vst [vmem:[#allocation2 + $0x18] sm:$0xf] %v601_v60  ;;  %604 = vst [vmem:[#allocation2 + $0x10] sm:$0xf] %v602_v61  ;;  %v572_v21 = vpop.permute.xlu1 %571 }
 0x390   : > { %v573_v22 = vsel %vm268_vm8, %v570_v18, %v572_v21  ;;  %v574_v25 = vsel %vm268_vm8, %v572_v21, %v570_v18 }
 0x391   : > { %v575_v26 = vmul.f32 %v574_v25, %v1544_v33  ;;  %v576_v29 = vmul.f32 %v573_v22, %v1547_v34 }
 0x393   : > { %577 = vst [vmem:[#allocation2 + $0x30] sm:$0xf] %v575_v26  ;;  %578 = vst [vmem:[#allocation2] sm:$0xf] %v576_v29 }
 0x396   : > { %v679_v7 = vld [vmem:[#allocation2 + $0x10] sm:$0xff]  ;;  %v678_v14 = vld [vmem:[#allocation2 + $0x18] sm:$0xff] }
 0x397   : > { %723 = vmatprep.subr.mxu1 %v679_v7 }
 0x398   : > { %724 = vmatpush1.msra.mxu1 %v678_v14 }
 0x39a   : > { %v677_v30 = vld [vmem:[#allocation2] sm:$0xff]  ;;  %v676_v4 = vld [vmem:[#allocation2 + $0x30] sm:$0xff] }
 0x39b   : > { %725 = vmatprep.subr.mxu1 %v677_v30 }
 0x39c   : > { %726 = vmatpush1.msra.mxu1 %v676_v4 }
 0x39d   : > { %934 = vmatmul.mubr.msk.f32.vlgmr.msra.gmra.mxu1 %vm453_vm9, %v675_v31 }
 0x45d   : > { %v761_v32 = vpop.f32.mrf.mxu1 }
 0x45e   : > { %v766_v35 = vsel %vm457_vm4, %v761_v32, 0.0 }
 0x45f   : > { %v763_v5 = vpop.f32.mrf.mxu1 }
 0x460   : > { %v767_v33 = vsel %vm457_vm4, %v763_v5, 0.0 }
 0x461   : > { %v768_v34 = vadd.f32 %v767_v33, %v766_v35 }
 0x463   : > { %769 = vadd.xlane.f32.xlu0 %v768_v34 }
 0x4ec   : > { %v770_v36 = vpop.xlane.xlu0 %769 }
 0x4ed   : > { %v771_v37 = vmul.f32 0.00390625, %v770_v36 }
 0x4ef   : > { %v772_v38 = vsub.f32 %v761_v32, %v771_v37  ;;  %v773_v39 = vsub.f32 %v763_v5, %v771_v37 }
 0x4f1   : > { %v774_v40 = vmul.f32 %v772_v38, %v772_v38  ;;  %v775_v9 = vmul.f32 %v773_v39, %v773_v39 }
 0x4f3   : > { %v776_v23 = vsel %vm457_vm4, %v774_v40, 0.0  ;;  %v777_v24 = vsel %vm457_vm4, %v775_v9, 0.0 }
 0x4f4   : > { %v778_v10 = vadd.f32 %v777_v24, %v776_v23 }
 0x4f6   : > { %779 = vadd.xlane.f32.xlu1 %v778_v10 }
 0x57f   : > { %v780_v41 = vpop.xlane.xlu1 %779 }
 0x580   : > { %v781_v42 = vmul.f32 0.00390625, %v780_v41 }
 0x582   : > { %v782_v43 = vadd.f32 1e-05, %v781_v42 }
 0x584   : > { %1033 = vrsqrt.f32 %v782_v43 }
 0x591   : > { %v1034_v44 = vpop.eup %1033 }
 0x592   : > { %v784_v45 = vmul.f32 %v1034_v44, %v772_v38  ;;  %v785_v12 = vmul.f32 %v1034_v44, %v773_v39 }
 0x594   : > { %vm786_vm12 = vcmp.ge.f32.partialorder %v784_v45, 0.0  ;;  %vm787_vm13 = vcmp.ge.f32.partialorder %v785_v12, 0.0  ;;  %v788_v13 = vmul.f32 0.2, %v784_v45  ;;  %v789_v47 = vmul.f32 0.2, %v785_v12 }
 0x596   : > { %v790_v48 = vsel %vm786_vm12, %v784_v45, %v788_v13  ;;  %v791_v50 = vsel %vm787_vm13, %v785_v12, %v789_v47 }
 0x597   : > { %v794_v51 = vcombine.low %v790_v48, %v791_v50 }
 0x599   : > { %v796_v19 = vadd.f32 %v794_v51, %v1407_v0 }
 0x59b   : > { %797 = vst [vmem:[%s253_s30] sm:$0xff] %v796_v19 }
 0x59c   : > { %1154 = shalt.err (!%p1151_p3)
}
 0x59d   : > { %s1155_s8 = scalar_lea.hbm %s811_s14, 128  ;;  %s1159_s11 = scalar_lea.hbm %s1674_s4, 256 }
 0x59e   : > { %p1156_p4 = scmp.ne.s32.totalorder %s811_s14, %s1155_s8  ;;  %p1160_p11 = scmp.lt.s32.totalorder %s811_s14, %s1674_s4 }
 0x59f   : > { %p1161_p6 = scmp.lt.s32.totalorder %s1159_s11, %s1155_s8 }
 0x5a0   : > { %p1157_p2 = pnand %p1156_p4, %p1692_p5 }
 0x5a1   : > { %p1162_p8 = por %p1161_p6, %p1160_p11 }
 0x5a2   : > { %p1158_p9 = pneg %p1157_p2 }
 0x5a4   : > { %p1163_p12 = pnand %p1162_p8, %p1158_p9 }
 0x5a6   : > { %1166 = shalt.err (!%p1163_p12)
}
 0x5a7   : > { %956 = dma.vmem_to_hbm [thread:$0]  (%p1692_p5), %s814_s28, 128, %s811_s14, %s799_s20  }
 0x5a8 PF: > { %s825_s26 = sand.u32 1, %s1201_s15   ;;  %p1693_p7 = scmp.ne.s32.totalorder %s1680_s22, 0 }
 0x5a9   : > { %p1694_p10 = scmp.ge.s32.totalorder %s1213_s18, 2  ;;  %s826_s5 = scalar_lea.sflag [#allocation5], %s825_s26 }
 0x5ab   : > { %p973_p13 = pnand %p1694_p10, %p1693_p7 }
 0x5ad   : > { %p974_p0 = pneg %p973_p13 }
 0x5af   : > { %1196 = dma.done.wait (%p974_p0), %s826_s5, 128  }
 0x5b0   : > { %1198 = vsyncadd (%p974_p0), %s826_s5, 4294967168  ;;  %p19_p1 = scmp.ge.s32.totalorder %s1343_s24, 4   ;;  %s1695_s15 = smov %s1205_s16 }
 0x5b1   : > { %s1696_s16 = smov %s1209_s17  ;;  %s1697_s17 = smov %s1353_s27 }
 0x5b2   : > { %s1698_s18 = smov %s1343_s24  ;;  %21 = sbr.rel (!%p19_p1) target bundleno = 7 (0x7), region = 93 }
 0x5b7   :  { %831 = vsyncpa [#allocation4], 1 }
 0x5b8   :  { %833 = vsyncpa [#allocation4 + $0x1], 1 }
 0x5b9   :  { %834 = vsyncpa [#allocation7], 1 }
 0x5ba   :  { %835 = vsyncpa [#allocation10], 1 }
 0x5bb   :  { %836 = vsyncpa [#allocation5], 1 }
 0x5bc   :  { %838 = vsyncpa [#allocation5 + $0x1], 1 }

</bundles_post_ra>
